<compile_context>
chip_gen: v7x
topology: tpu7x:2x2x1
jax: 0.10.0
libtpu: 0.0.40
codegen_flags: <defaults>
</compile_context>

<pallas_src>
from typing import NamedTuple

import jax
import jax.numpy as jnp
from jax.experimental import pallas as pl
from jax.experimental.pallas import tpu as pltpu


class ResData(NamedTuple):
    logits: jax.Array
    mean: jax.Array


def _round_up(n, m):
    return ((n + m - 1) // m) * m


def _pad2(a, rows, cols):
    return jnp.pad(a, ((0, rows - a.shape[0]), (0, cols - a.shape[1])))


def _decoder_kernel(x_ref,
                    w1_ref, b1_ref,
                    w2_ref, b2_ref,
                    w34_ref, b34_ref,
                    out_ref):
    # In-kernel cast to bf16 (MXU-native); accumulation / bias / ReLU in f32.
    x = x_ref[...].astype(jnp.bfloat16)

    # Linear(latent, 128) + ReLU
    h = jnp.dot(x, w1_ref[...], preferred_element_type=jnp.float32) + b1_ref[...]
    h = jnp.maximum(h, 0.0).astype(jnp.bfloat16)

    # Linear(128, 128) + ReLU
    h = jnp.dot(h, w2_ref[...], preferred_element_type=jnp.float32) + b2_ref[...]
    h = jnp.maximum(h, 0.0).astype(jnp.bfloat16)

    # Fused Linear(128, n_class_p)  ==  Linear(100,10) ∘ Linear(10,n_class)
    y = jnp.dot(h, w34_ref[...], preferred_element_type=jnp.float32) + b34_ref[...]

    out_ref[...] = y.astype(out_ref.dtype)


def decoder_forward(x, params, tile_b=2048, out_dtype=jnp.bfloat16):
    """Full Decoder forward pass as a single batch-tiled Pallas kernel.

    x: (B, latent_dims) float32
    params: dict with w1,b1,w2,b2,w3,b3,w4,b4 (weights are (in, out), biases (1, out))
    returns ResData(logits, mean) with shape (B, n_class), dtype `out_dtype`.
    """
    B, latent = x.shape
    n_class = params["w4"].shape[1]

    H = 128                                  # hidden 100 -> 128 (lane-dense)
    NCP = _round_up(n_class, 128)            # output padded to lane multiple

    # --- fuse the two un-activated final linears (done once, in f32) ---
    w34 = params["w3"] @ params["w4"]                       # (100, n_class)
    b34 = params["b3"] @ params["w4"] + params["b4"]        # (1, n_class)

    # --- zero-pad + cast weights (bf16) and biases (f32); all tiny, one-time ---
    w1p = _pad2(params["w1"], latent, H).astype(jnp.bfloat16)   # (latent, 128)
    b1p = _pad2(params["b1"], 1, H).astype(jnp.float32)
    w2p = _pad2(params["w2"], H, H).astype(jnp.bfloat16)
    b2p = _pad2(params["b2"], 1, H).astype(jnp.float32)
    w34p = _pad2(w34, H, NCP).astype(jnp.bfloat16)
    b34p = _pad2(b34, 1, NCP).astype(jnp.float32)

    # --- batch tiling: collapse small B to one grid step, big tiles otherwise ---
    B8 = _round_up(B, 8)
    if B8 <= tile_b:
        tb = B8                               # single grid step
        B_pad = B8
    else:
        tb = _round_up(min(tile_b, B8), 8)
        B_pad = _round_up(B8, tb)

    xp = x if B_pad == B else jnp.pad(x, ((0, B_pad - B), (0, 0)))

    grid = (B_pad // tb,)

    out = pl.pallas_call(
        _decoder_kernel,
        out_shape=jax.ShapeDtypeStruct((B_pad, NCP), out_dtype),
        grid=grid,
        in_specs=[
            # x: tiled over batch, full latent extent (no lane padding needed).
            pl.BlockSpec((tb, latent), lambda i: (i, 0)),
            # weights/biases: constant index_map -> VMEM-resident across steps.
            pl.BlockSpec((latent, H), lambda i: (0, 0)),
            pl.BlockSpec((1, H), lambda i: (0, 0)),
            pl.BlockSpec((H, H), lambda i: (0, 0)),
            pl.BlockSpec((1, H), lambda i: (0, 0)),
            pl.BlockSpec((H, NCP), lambda i: (0, 0)),
            pl.BlockSpec((1, NCP), lambda i: (0, 0)),
        ],
        out_specs=pl.BlockSpec((tb, NCP), lambda i: (i, 0)),
        compiler_params=pltpu.CompilerParams(
            dimension_semantics=("parallel",)),
    )(xp, w1p, b1p, w2p, b2p, w34p, b34p)

    # Slice only what is actually padded (avoid an extra HBM pass when the
    # batch is already tile-aligned).
    logits = out[:, :n_class] if B_pad == B else out[:B, :n_class]
    return ResData(logits=logits, mean=logits)


def init_decoder_params(key, latent_dims, n_class):
    """Deterministic synthetic init (PyTorch-style uniform fan-in scaling)."""
    def linear_init(k, fan_in, fan_out):
        kw, kb = jax.random.split(k)
        bound = 1.0 / jnp.sqrt(fan_in)
        # stored transposed relative to torch: (in, out)
        w = jax.random.uniform(kw, (fan_in, fan_out), jnp.float32, -bound, bound)
        b = jax.random.uniform(kb, (1, fan_out), jnp.float32, -bound, bound)
        return w, b

    k1, k2, k3, k4 = jax.random.split(key, 4)
    w1, b1 = linear_init(k1, latent_dims, 100)
    w2, b2 = linear_init(k2, 100, 100)
    w3, b3 = linear_init(k3, 100, 10)
    w4, b4 = linear_init(k4, 10, n_class)
    return dict(w1=w1, b1=b1, w2=w2, b2=b2, w3=w3, b3=b3, w4=w4, b4=b4)


if __name__ == "__main__":
    key = jax.random.PRNGKey(0)
    kx, kp = jax.random.split(key)

    batch = 35          # deliberately not a multiple of 8 -> exercises batch padding
    latent_dims = 32
    n_class = 4

    x = jax.random.normal(kx, (batch, latent_dims), jnp.float32)
    params = init_decoder_params(kp, latent_dims, n_class)

    # Reference in plain f32 JAX (kernel uses bf16 inputs/weights + f32
    # accumulation and a bf16 output slab -> bf16-appropriate tolerance).
    def ref_forward(x, p):
        h = jnp.maximum(x @ p["w1"] + p["b1"], 0.0)
        h = jnp.maximum(h @ p["w2"] + p["b2"], 0.0)
        h = h @ p["w3"] + p["b3"]
        return h @ p["w4"] + p["b4"]

    expected = ref_forward(x, params)

    # 1) Default path: single grid step (batch collapses into one tile).
    res = decoder_forward(x, params)
    jax.block_until_ready(res.logits)
    assert res.logits.shape == (batch, n_class)
    assert jnp.allclose(res.logits.astype(jnp.float32), expected,
                        atol=3e-2, rtol=3e-2), (
        float(jnp.max(jnp.abs(res.logits.astype(jnp.float32) - expected))))
    assert jnp.array_equal(res.logits, res.mean)

    # 2) Multi-step grid path (small tile purely to exercise correctness of the
    #    batch-tiled pipeline; production default stays at tile_b=2048).
    res2 = decoder_forward(x, params, tile_b=16)
    jax.block_until_ready(res2.logits)
    assert res2.logits.shape == (batch, n_class)
    assert jnp.allclose(res2.logits.astype(jnp.float32), expected,
                        atol=3e-2, rtol=3e-2), (
        float(jnp.max(jnp.abs(res2.logits.astype(jnp.float32) - expected))))

    print("KERNEL_OK")
</pallas_src>

<mosaic_0001>
module attributes {stable_mosaic.version = 11 : i64} {
  func.func @_decoder_kernel(%arg0: i32, %arg1: memref<40x32xf32, #tpu.memory_space<vmem>>, %arg2: memref<32x128xbf16, #tpu.memory_space<vmem>>, %arg3: memref<1x128xf32, #tpu.memory_space<vmem>>, %arg4: memref<128x128xbf16, #tpu.memory_space<vmem>>, %arg5: memref<1x128xf32, #tpu.memory_space<vmem>>, %arg6: memref<128x128xbf16, #tpu.memory_space<vmem>>, %arg7: memref<1x128xf32, #tpu.memory_space<vmem>>, %arg8: memref<40x128xbf16, #tpu.memory_space<vmem>>) attributes {dimension_semantics = [#tpu.dimension_semantics<parallel>], iteration_bounds = array<i64: 1>, scalar_prefetch = 0 : i64, scratch_operands = 0 : i64, tpu.core_type = #tpu.core_type<tc>, window_params = [{transform_indices = @transform_0, window_bounds = array<i64: 40, 32>}, {pipeline_mode = #tpu.pipeline_mode<synchronous>, transform_indices = @transform_1, window_bounds = array<i64: 32, 128>}, {pipeline_mode = #tpu.pipeline_mode<synchronous>, transform_indices = @transform_2, window_bounds = array<i64: 1, 128>}, {pipeline_mode = #tpu.pipeline_mode<synchronous>, transform_indices = @transform_3, window_bounds = array<i64: 128, 128>}, {pipeline_mode = #tpu.pipeline_mode<synchronous>, transform_indices = @transform_4, window_bounds = array<i64: 1, 128>}, {pipeline_mode = #tpu.pipeline_mode<synchronous>, transform_indices = @transform_5, window_bounds = array<i64: 128, 128>}, {pipeline_mode = #tpu.pipeline_mode<synchronous>, transform_indices = @transform_6, window_bounds = array<i64: 1, 128>}, {transform_indices = @transform_7, window_bounds = array<i64: 40, 128>}]} {
    %c0 = arith.constant 0 : index
    %c0_0 = arith.constant 0 : index
    %0 = vector.load %arg1[%c0, %c0_0] : memref<40x32xf32, #tpu.memory_space<vmem>>, vector<40x32xf32>
    %1 = arith.truncf %0 : vector<40x32xf32> to vector<40x32xbf16>
    %c0_1 = arith.constant 0 : index
    %c0_2 = arith.constant 0 : index
    %2 = vector.load %arg2[%c0_1, %c0_2] : memref<32x128xbf16, #tpu.memory_space<vmem>>, vector<32x128xbf16>
    %cst = arith.constant dense<0.000000e+00> : vector<40x128xf32>
    %3 = tpu.matmul %1, %2, %cst {dimension_numbers = #tpu.dot_dimension_numbers<[1], [0], [0], [1], [0, 0, 1, 1], [], []>} : vector<40x32xbf16>, vector<32x128xbf16>, vector<40x128xf32> -> vector<40x128xf32>
    %c0_3 = arith.constant 0 : index
    %c0_4 = arith.constant 0 : index
    %4 = vector.load %arg3[%c0_3, %c0_4] : memref<1x128xf32, #tpu.memory_space<vmem>>, vector<1x128xf32>
    %5 = vector.broadcast %4 : vector<1x128xf32> to vector<40x128xf32>
    %6 = arith.addf %3, %5 : vector<40x128xf32>
    %cst_5 = arith.constant 0.000000e+00 : f32
    %7 = vector.broadcast %cst_5 : f32 to vector<40x128xf32>
    %8 = arith.maximumf %6, %7 : vector<40x128xf32>
    %9 = arith.truncf %8 : vector<40x128xf32> to vector<40x128xbf16>
    %c0_6 = arith.constant 0 : index
    %c0_7 = arith.constant 0 : index
    %10 = vector.load %arg4[%c0_6, %c0_7] : memref<128x128xbf16, #tpu.memory_space<vmem>>, vector<128x128xbf16>
    %cst_8 = arith.constant dense<0.000000e+00> : vector<40x128xf32>
    %11 = tpu.matmul %9, %10, %cst_8 {dimension_numbers = #tpu.dot_dimension_numbers<[1], [0], [0], [1], [0, 0, 1, 1], [], []>} : vector<40x128xbf16>, vector<128x128xbf16>, vector<40x128xf32> -> vector<40x128xf32>
    %c0_9 = arith.constant 0 : index
    %c0_10 = arith.constant 0 : index
    %12 = vector.load %arg5[%c0_9, %c0_10] : memref<1x128xf32, #tpu.memory_space<vmem>>, vector<1x128xf32>
    %13 = vector.broadcast %12 : vector<1x128xf32> to vector<40x128xf32>
    %14 = arith.addf %11, %13 : vector<40x128xf32>
    %cst_11 = arith.constant 0.000000e+00 : f32
    %15 = vector.broadcast %cst_11 : f32 to vector<40x128xf32>
    %16 = arith.maximumf %14, %15 : vector<40x128xf32>
    %17 = arith.truncf %16 : vector<40x128xf32> to vector<40x128xbf16>
    %c0_12 = arith.constant 0 : index
    %c0_13 = arith.constant 0 : index
    %18 = vector.load %arg6[%c0_12, %c0_13] : memref<128x128xbf16, #tpu.memory_space<vmem>>, vector<128x128xbf16>
    %cst_14 = arith.constant dense<0.000000e+00> : vector<40x128xf32>
    %19 = tpu.matmul %17, %18, %cst_14 {dimension_numbers = #tpu.dot_dimension_numbers<[1], [0], [0], [1], [0, 0, 1, 1], [], []>} : vector<40x128xbf16>, vector<128x128xbf16>, vector<40x128xf32> -> vector<40x128xf32>
    %c0_15 = arith.constant 0 : index
    %c0_16 = arith.constant 0 : index
    %20 = vector.load %arg7[%c0_15, %c0_16] : memref<1x128xf32, #tpu.memory_space<vmem>>, vector<1x128xf32>
    %21 = vector.broadcast %20 : vector<1x128xf32> to vector<40x128xf32>
    %22 = arith.addf %19, %21 : vector<40x128xf32>
    %23 = arith.truncf %22 : vector<40x128xf32> to vector<40x128xbf16>
    %c0_17 = arith.constant 0 : index
    %c0_18 = arith.constant 0 : index
    %24 = vector.load %arg8[%c0_17, %c0_18] : memref<40x128xbf16, #tpu.memory_space<vmem>>, vector<40x128xbf16>
    tpu.vector_store %arg8[%c0_17, %c0_18], %23 {strides = array<i32>} : memref<40x128xbf16, #tpu.memory_space<vmem>>, vector<40x128xbf16>,
    return
  }
  func.func @transform_0(%arg0: i32) -> (i32, i32) {
    %c0_i32 = arith.constant 0 : i32
    %c0_i32_0 = arith.constant 0 : i32
    return %arg0, %c0_i32 : i32, i32
  }
  func.func @transform_1(%arg0: i32) -> (i32, i32) {
    %c0_i32 = arith.constant 0 : i32
    %c0_i32_0 = arith.constant 0 : i32
    %c0_i32_1 = arith.constant 0 : i32
    return %c0_i32, %c0_i32_0 : i32, i32
  }
  func.func @transform_2(%arg0: i32) -> (i32, i32) {
    %c0_i32 = arith.constant 0 : i32
    %c0_i32_0 = arith.constant 0 : i32
    %c0_i32_1 = arith.constant 0 : i32
    return %c0_i32, %c0_i32_0 : i32, i32
  }
  func.func @transform_3(%arg0: i32) -> (i32, i32) {
    %c0_i32 = arith.constant 0 : i32
    %c0_i32_0 = arith.constant 0 : i32
    %c0_i32_1 = arith.constant 0 : i32
    return %c0_i32, %c0_i32_0 : i32, i32
  }
  func.func @transform_4(%arg0: i32) -> (i32, i32) {
    %c0_i32 = arith.constant 0 : i32
    %c0_i32_0 = arith.constant 0 : i32
    %c0_i32_1 = arith.constant 0 : i32
    return %c0_i32, %c0_i32_0 : i32, i32
  }
  func.func @transform_5(%arg0: i32) -> (i32, i32) {
    %c0_i32 = arith.constant 0 : i32
    %c0_i32_0 = arith.constant 0 : i32
    %c0_i32_1 = arith.constant 0 : i32
    return %c0_i32, %c0_i32_0 : i32, i32
  }
  func.func @transform_6(%arg0: i32) -> (i32, i32) {
    %c0_i32 = arith.constant 0 : i32
    %c0_i32_0 = arith.constant 0 : i32
    %c0_i32_1 = arith.constant 0 : i32
    return %c0_i32, %c0_i32_0 : i32, i32
  }
  func.func @transform_7(%arg0: i32) -> (i32, i32) {
    %c0_i32 = arith.constant 0 : i32
    %c0_i32_0 = arith.constant 0 : i32
    return %arg0, %c0_i32 : i32, i32
  }
}

</mosaic_0001>

<bundles_post_ra>
// kernel: tpu_custom_call.1
= control target key start
LH: loop header
LB: loop body
LE: loop exit
PB: predicated region body
PF: predicated region fallthrough
CT: control target
= control target key end

     0   :  { %12 = vsyncpa [#allocation3], 0  ;;  %s837_s0 = inlined_call_operand.vmem [shape: f32[40,32], index: 0, kind: input, shape index: {}]   ;;  %s838_s1 = inlined_call_operand.vmem [shape: bf16[32,128], index: 1, kind: input, shape index: {}]   ;;  %s839_s2 = inlined_call_operand.vmem [shape: f32[1,128], index: 2, kind: input, shape index: {}]   ;;  %s840_s3 = inlined_call_operand.vmem [shape: bf16[128,128], index: 3, kind: input, shape index: {}]   ;;  %s841_s4 = inlined_call_operand.vmem [shape: f32[1,128], index: 4, kind: input, shape index: {}]   ;;  %s842_s5 = inlined_call_operand.hbm [shape: bf16[128,128], index: 5, kind: input, shape index: {}]   ;;  %s843_s6 = inlined_call_operand.vmem [shape: f32[1,128], index: 6, kind: input, shape index: {}]   ;;  %s844_s7 = inlined_call_operand.hbm [shape: bf16[40,128], index: 7, kind: output, shape index: {}]  }
   0x1   :  { %13 = vsyncpa [#allocation4], 0  ;;  %s668_s24 = smov [#allocation2]   ;;  %s620_s28 = scalar_lea.hbm %s842_s5, 1024 }
   0x2   :  { %s29_s25 = sshll.u32 %s668_s24, 4  ;;  %p621_p0 = scmp.ne.s32.totalorder %s842_s5, %s620_s28  ;;  %s30_s25 = int_to_ptr.vmem [resolvable:$true] %s29_s25 }
   0x3   :  { %p624_p1 = scmp.lt.u32.totalorder %s620_s28, %s842_s5 }
   0x5   :  { %p626_p2 = pnand %p624_p1, %p621_p0 }
   0x7   :  { %629 = shalt.err (!%p626_p2)
}
   0x8   :  { %s630_s10 = scalar_lea.vmem %s30_s25, 1024  ;;  %p635_p4 = scmp.lt.s32.totalorder %s30_s25, %s30_s25 }
   0x9   :  { %p631_p3 = scmp.ne.s32.totalorder %s30_s25, %s630_s10  ;;  %p636_p5 = scmp.lt.s32.totalorder %s630_s10, %s630_s10 }
   0xb   :  { %p637_p6 = por %p636_p5, %p635_p4 }
   0xd   :  { %p638_p7 = pnand %p637_p6, %p631_p3 }
   0xf   :  { %641 = shalt.err (!%p638_p7)
}
  0x10   :  { %s669_s11 = smov 64   ;;  %s670_s12 = smov 4  }
  0x11   :  { %35 = dma.hbm_to_vmem [thread:$0]  %s842_s5, 1024, %s30_s25, [#allocation3], %s669_s11, %s669_s11, %s670_s12  }
  0x12   :  { %664 = dma.done.wait [#allocation3], 1024  }
  0x13   :  { %665 = vsyncadd [#allocation3], 4294966272  ;;  %v671_v0 = vmov 0.0   ;;  %vm672_vm0 = vmmov 0   ;;  %v602_v1 = vld [vmem:[%s838_s1] sm:$0xff]   ;;  %v603_v2 = vld [vmem:[%s838_s1 + $0x8] sm:$0xff]  }
  0x14   :  { %524 = vmatprep.subr.bf16.mxu0 %v671_v0  ;;  %528 = vmatprep.mubr.msk.bf16.mxu0 %vm672_vm0, %v671_v0  ;;  %v42_v3 = vld [vmem:[%s837_s0] sm:$0xff]  ;;  %v43_v4 = vld [vmem:[%s837_s0 + $0x8] sm:$0xff]  ;;  %vm73_vm1 = vcmask 261120   ;;  %v44_v8 = vld [vmem:[%s837_s0 + $0x10] sm:$0xff]  ;;  %s673_s23 = smov [#allocation5]  }
  0x15   :  { %540 = vmatprep.subr.bf16.mxu1 %v671_v0  ;;  %556 = vmatprep.mubr.msk.bf16.mxu1 %vm672_vm0, %v671_v0  ;;  %v604_v5 = vld [vmem:[%s840_s3] sm:$0xff]   ;;  %v47_v6 = vpack.c.bf16 %v43_v4, %v42_v3  ;;  %v605_v7 = vld [vmem:[%s840_s3 + $0x8] sm:$0xff]   ;;  %v45_v9 = vld [vmem:[%s837_s0 + $0x18] sm:$0xff]  ;;  %s440_s24 = sshll.u32 %s673_s23, 4  ;;  %s441_s24 = int_to_ptr.vmem [resolvable:$true] %s440_s24 }
  0x16   :  { %525 = vmatpush3.bf16.msra.mxu0 %v602_v1  ;;  %541 = vmatpush3.bf16.msra.mxu1 %v604_v5  ;;  %v606_v10 = vld [vmem:[%s840_s3 + $0x10] sm:$0xff]   ;;  %v607_v11 = vld [vmem:[%s840_s3 + $0x18] sm:$0xff]   ;;  %v48_v12 = vpack.c.bf16 %v45_v9, %v44_v8  ;;  %v46_v13 = vld [vmem:[%s837_s0 + $0x20] sm:$0xff]  ;;  %p647_p9 = scmp.lt.s32.totalorder %s441_s24, %s441_s24 }
  0x17   :  { %526 = vmatprep.subr.bf16.mxu0 %v671_v0  ;;  %542 = vmatprep.subr.bf16.mxu1 %v671_v0  ;;  %v608_v14 = vld [vmem:[%s840_s3 + $0x20] sm:$0xff]   ;;  %v49_v15 = vpack.c.bf16 %v46_v13, %v46_v13  ;;  %v609_v16 = vld [vmem:[%s840_s3 + $0x28] sm:$0xff]   ;;  %v610_v17 = vld [vmem:[%s840_s3 + $0x30] sm:$0xff]  }
  0x18   :  { %v611_v18 = vld [vmem:[%s840_s3 + $0x38] sm:$0xff]   ;;  %v612_v19 = vld [vmem:[#allocation2] sm:$0xff]   ;;  %v613_v20 = vld [vmem:[#allocation2 + $0x8] sm:$0xff]  }
  0x19   :  { %v614_v21 = vld [vmem:[#allocation2 + $0x10] sm:$0xff]   ;;  %v615_v22 = vld [vmem:[#allocation2 + $0x18] sm:$0xff]   ;;  %v616_v23 = vld [vmem:[#allocation2 + $0x20] sm:$0xff]  }
  0x1a   :  { %527 = vmatpush3.bf16.msra.mxu0 %v603_v2  ;;  %543 = vmatpush3.bf16.msra.mxu1 %v605_v7  ;;  %v617_v24 = vld [vmem:[#allocation2 + $0x28] sm:$0xff]   ;;  %v452_v25 = vld [vmem:[%s839_s2] ss:$0 sm:$0xff]  ;;  %v618_v51 = vld [vmem:[#allocation2 + $0x30] sm:$0xff]  }
  0x1b   :  { %568 = vmatprep.subr.bf16.mxu0 %v671_v0  ;;  %544 = vmatprep.subr.bf16.mxu1 %v671_v0  ;;  %v619_v52 = vld [vmem:[#allocation2 + $0x38] sm:$0xff]   ;;  %v458_v53 = vld [vmem:[%s841_s4] ss:$0 sm:$0xff] }
  0x1d   :  { %529 = vmatmul.mubr.msk.bf16.vlgmr.msra.gmra.mrb[0].mxu0 %vm73_vm1, %v47_v6 }
  0x1e   :  { %532 = vmatprep.mubr.msk.bf16.mxu0 %vm672_vm0, %v671_v0  ;;  %545 = vmatpush3.bf16.msra.mxu1 %v606_v10 }
  0x1f   :  { %546 = vmatprep.subr.bf16.mxu1 %v671_v0  ;;  %569 = vmatpush3.bf16.msra.mxu0 %v612_v19 }
  0x20   :  { %570 = vmatprep.subr.bf16.mxu0 %v671_v0 }
  0x22   :  { %547 = vmatpush3.bf16.msra.mxu1 %v607_v11 }
  0x23   :  { %548 = vmatprep.subr.bf16.mxu1 %v671_v0  ;;  %571 = vmatpush3.bf16.msra.mxu0 %v613_v20 }
  0x24   :  { %572 = vmatprep.subr.bf16.mxu0 %v671_v0 }
  0x25   :  { %533 = vmatmul.mubr.msk.bf16.gmra.mrb[4].mxu0 %vm73_vm1, %v48_v12 }
  0x26   :  { %536 = vmatprep.mubr.msk.bf16.mxu0 %vm672_vm0, %v671_v0  ;;  %549 = vmatpush3.bf16.msra.mxu1 %v608_v14 }
  0x27   :  { %550 = vmatprep.subr.bf16.mxu1 %v671_v0  ;;  %573 = vmatpush3.bf16.msra.mxu0 %v614_v21 }
  0x28   :  { %574 = vmatprep.subr.bf16.mxu0 %v671_v0 }
  0x2a   :  { %551 = vmatpush3.bf16.msra.mxu1 %v609_v16  ;;  %v467_v16 = vld [vmem:[%s843_s6] ss:$0 sm:$0xff]  ;;  %s642_s6 = scalar_lea.vmem %s441_s24, 320 }
  0x2b   :  { %552 = vmatprep.subr.bf16.mxu1 %v671_v0  ;;  %575 = vmatpush3.bf16.msra.mxu0 %v615_v22  ;;  %p643_p8 = scmp.ne.s32.totalorder %s441_s24, %s642_s6  ;;  %p648_p10 = scmp.lt.s32.totalorder %s642_s6, %s642_s6 }
  0x2c   :  { %576 = vmatprep.subr.bf16.mxu0 %v671_v0 }
  0x2d   :  { %537 = vmatmul.mubr.msk.bf16.gmra.mrb[8].mxu0 %vm73_vm1, %v49_v15  ;;  %p649_p11 = por %p648_p10, %p647_p9 }
  0x2e   :  { %584 = vmatprep.mubr.msk.bf16.mxu0 %vm672_vm0, %v671_v0  ;;  %553 = vmatpush3.bf16.msra.mxu1 %v610_v17 }
  0x2f   :  { %554 = vmatprep.subr.bf16.mxu1 %v671_v0  ;;  %577 = vmatpush3.bf16.msra.mxu0 %v616_v23  ;;  %p650_p12 = pnand %p649_p11, %p643_p8 }
  0x30   :  { %578 = vmatprep.subr.bf16.mxu0 %v671_v0 }
  0x32   :  { %555 = vmatpush3.bf16.msra.mxu1 %v611_v18 }
  0x33   :  { %579 = vmatpush3.bf16.msra.mxu0 %v617_v24 }
  0x34   :  { %580 = vmatprep.subr.bf16.mxu0 %v671_v0 }
  0x37   :  { %581 = vmatpush3.bf16.msra.mxu0 %v618_v51 }
  0x38   :  { %582 = vmatprep.subr.bf16.mxu0 %v671_v0 }
  0x3b   :  { %583 = vmatpush3.bf16.msra.mxu0 %v619_v52 }
  0xf0   :  { %v117_v26 = vpop.f32.mrb[0].mxu0 }
  0xf1   :  { %v118_v27 = vadd.f32 %v452_v25, %v117_v26  ;;  %v530_v28 = vpop.f32.mrb[1].mxu0 }
  0xf2   :  { %v120_v29 = vpop.f32.mrb[2].mxu0 }
  0xf3   :  { %v121_v30 = vadd.f32 %v452_v25, %v120_v29  ;;  %v531_v31 = vpop.f32.mrb[3].mxu0  ;;  %v139_v32 = vmax.f32 %v118_v27, 0.0 }
  0xf5   :  { %v140_v33 = vmax.f32 %v121_v30, 0.0 }
  0xf7   :  { %v144_v34 = vpack.c.bf16 %v140_v33, %v139_v32 }
  0xf8   :  { %v125_v35 = vpop.f32.mrb[4].mxu0 }
  0xf9   :  { %v126_v36 = vadd.f32 %v452_v25, %v125_v35  ;;  %v534_v37 = vpop.f32.mrb[5].mxu0  ;;  %557 = vmatmul.mubr.bf16.vlgmr.msra.gmra.mrb[0].mxu1 %v144_v34 }
  0xfa   :  { %v128_v38 = vpop.f32.mrb[6].mxu0  ;;  %560 = vmatprep.mubr.msk.bf16.mxu1 %vm672_vm0, %v671_v0 }
  0xfb   :  { %v129_v39 = vadd.f32 %v452_v25, %v128_v38  ;;  %v535_v40 = vpop.f32.mrb[7].mxu0  ;;  %v141_v41 = vmax.f32 %v126_v36, 0.0 }
  0xfd   :  { %v142_v42 = vmax.f32 %v129_v39, 0.0 }
  0xff   :  { %v145_v43 = vpack.c.bf16 %v142_v42, %v141_v41 }
 0x100   :  { %v133_v44 = vpop.f32.mrb[8].mxu0 }
 0x101   :  { %v134_v45 = vadd.f32 %v452_v25, %v133_v44  ;;  %561 = vmatmul.mubr.bf16.gmra.mrb[4].mxu1 %v145_v43  ;;  %v538_v46 = vpop.f32.mrb[9].mxu0 }
 0x102   :  { %v136_v47 = vpop.f32.mrb[10].mxu0  ;;  %564 = vmatprep.mubr.msk.bf16.mxu1 %vm672_vm0, %v671_v0 }
 0x103   :  { %v143_v48 = vmax.f32 %v134_v45, 0.0  ;;  %v539_v49 = vpop.f32.mrb[11].mxu0 }
 0x105   :  { %v146_v50 = vpack.c.bf16 %v143_v48, %v143_v48 }
 0x109   :  { %565 = vmatmul.mubr.bf16.gmra.mrb[8].mxu1 %v146_v50 }
 0x1cc   :  { %v252_v54 = vpop.f32.mrb[0].mxu1 }
 0x1cd   :  { %v253_v55 = vadd.f32 %v458_v53, %v252_v54  ;;  %v558_v56 = vpop.f32.mrb[1].mxu1 }
 0x1ce   :  { %v255_v57 = vpop.f32.mrb[2].mxu1 }
 0x1cf   :  { %v256_v58 = vadd.f32 %v458_v53, %v255_v57  ;;  %v559_v59 = vpop.f32.mrb[3].mxu1  ;;  %v274_v60 = vmax.f32 %v253_v55, 0.0 }
 0x1d1   :  { %v275_v61 = vmax.f32 %v256_v58, 0.0 }
 0x1d3   :  { %v279_v62 = vpack.c.bf16 %v275_v61, %v274_v60 }
 0x1d4   :  { %v260_v63 = vpop.f32.mrb[4].mxu1 }
 0x1d5   :  { %v261_v1 = vadd.f32 %v458_v53, %v260_v63  ;;  %v562_v2 = vpop.f32.mrb[5].mxu1  ;;  %585 = vmatmul.mubr.bf16.vlgmr.msra.gmra.mrb[12].mxu0 %v279_v62 }
 0x1d6   :  { %v263_v3 = vpop.f32.mrb[6].mxu1  ;;  %588 = vmatprep.mubr.msk.bf16.mxu0 %vm672_vm0, %v671_v0 }
 0x1d7   :  { %v264_v4 = vadd.f32 %v458_v53, %v263_v3  ;;  %v563_v5 = vpop.f32.mrb[7].mxu1  ;;  %v276_v6 = vmax.f32 %v261_v1, 0.0 }
 0x1d9   :  { %v277_v7 = vmax.f32 %v264_v4, 0.0 }
 0x1db   :  { %v280_v8 = vpack.c.bf16 %v277_v7, %v276_v6 }
 0x1dc   :  { %v268_v9 = vpop.f32.mrb[8].mxu1 }
 0x1dd   :  { %v269_v10 = vadd.f32 %v458_v53, %v268_v9  ;;  %v566_v11 = vpop.f32.mrb[9].mxu1  ;;  %589 = vmatmul.mubr.bf16.gmra.mrb[16].mxu0 %v280_v8 }
 0x1de   :  { %v271_v12 = vpop.f32.mrb[10].mxu1  ;;  %592 = vmatprep.mubr.msk.bf16.mxu0 %vm672_vm0, %v671_v0 }
 0x1df   :  { %v278_v13 = vmax.f32 %v269_v10, 0.0  ;;  %v567_v14 = vpop.f32.mrb[11].mxu1 }
 0x1e1   :  { %v281_v15 = vpack.c.bf16 %v278_v13, %v278_v13 }
 0x1e5   :  { %593 = vmatmul.mubr.bf16.gmra.mrb[20].mxu0 %v281_v15 }
 0x2a8   :  { %v387_v17 = vpop.f32.mrb[12].mxu0 }
 0x2a9   :  { %v586_v18 = vpop.f32.mrb[13].mxu0  ;;  %v388_v20 = vadd.f32 %v467_v16, %v387_v17 }
 0x2aa   :  { %v390_v19 = vpop.f32.mrb[14].mxu0 }
 0x2ab   :  { %v391_v21 = vadd.f32 %v467_v16, %v390_v19  ;;  %v587_v22 = vpop.f32.mrb[15].mxu0 }
 0x2ad   :  { %v489_v23 = vpack.c.bf16 %v391_v21, %v388_v20 }
 0x2af   :  { %490 = vst [vmem:[#allocation5] sm:$0xff] %v489_v23  }
 0x2b0   :  { %v395_v24 = vpop.f32.mrb[16].mxu0 }
 0x2b1   :  { %v590_v25 = vpop.f32.mrb[17].mxu0  ;;  %v396_v0 = vadd.f32 %v467_v16, %v395_v24 }
 0x2b2   :  { %v398_v26 = vpop.f32.mrb[18].mxu0 }
 0x2b3   :  { %v399_v27 = vadd.f32 %v467_v16, %v398_v26  ;;  %v591_v28 = vpop.f32.mrb[19].mxu0 }
 0x2b5   :  { %v494_v29 = vpack.c.bf16 %v399_v27, %v396_v0 }
 0x2b7   :  { %496 = vst [vmem:[#allocation5 + $0x8] sm:$0xff] %v494_v29  }
 0x2b8   :  { %v403_v30 = vpop.f32.mrb[20].mxu0 }
 0x2b9   :  { %v404_v31 = vadd.f32 %v467_v16, %v403_v30  ;;  %v594_v32 = vpop.f32.mrb[21].mxu0 }
 0x2ba   :  { %v406_v33 = vpop.f32.mrb[22].mxu0 }
 0x2bb   :  { %v485_v34 = vpack.c.bf16 %v404_v31, %v404_v31  ;;  %v595_v35 = vpop.f32.mrb[23].mxu0 }
 0x2bd   :  { %434 = vst [vmem:[#allocation5 + $0x10] sm:$0xf] %v485_v34 }
 0x2be   :  { %653 = shalt.err (!%p650_p12)
}
 0x2bf   :  { %s654_s26 = scalar_lea.hbm %s844_s7, 320 }
 0x2c0   :  { %p655_p13 = scmp.ne.s32.totalorder %s844_s7, %s654_s26  ;;  %p658_p0 = scmp.lt.u32.totalorder %s654_s26, %s844_s7 }
 0x2c2   :  { %p660_p1 = pnand %p658_p0, %p655_p13 }
 0x2c4   :  { %663 = shalt.err (!%p660_p1)
}
 0x2c5   :  { %446 = dma.vmem_to_hbm [thread:$0]  %s441_s24, 320, %s844_s7, [#allocation4], %s669_s11, %s669_s11, %s670_s12  }
 0x2c6   :  { %666 = dma.done.wait [#allocation4], 320  }
 0x2c7   :  { %667 = vsyncadd [#allocation4], 4294966976 }
 0x2c8   :  { %450 = vsyncpa [#allocation3], 1 }
 0x2c9   :  { %451 = vsyncpa [#allocation4], 1 }

</bundles_post_ra>
